<compile_context>
chip_gen: v7x
topology: tpu7x:2x2x1
jax: 0.10.0
libtpu: 0.0.40
codegen_flags: <defaults>
</compile_context>

<pallas_src>
import functools
import math

import numpy as np
import jax
import jax.numpy as jnp
from jax import lax
from jax.experimental import pallas as pl
from jax.experimental.pallas import tpu as pltpu

# ---------------- problem sizes (small, consistent with the module) ----------------
B = 2          # batch
S = 8          # sequence length
H = 4          # number of heads
D_MODEL = 32   # model dim
D_K = D_MODEL // H

# Constant block-diagonal head-selection mask, passed to the kernel as a plain input
# (avoids in-kernel integer division / constant-lifting corner cases).
#   HEAD_MASK[h*S + i, c] = 1.0  iff lane c belongs to head h  (c // D_K == h)
_LANE_HEAD = np.arange(D_MODEL) // D_K                                        # (D,)
HEAD_MASK = np.repeat(
    (np.arange(H)[:, None] == _LANE_HEAD[None, :]).astype(np.float32), S, axis=0
)                                                                             # (H*S, D)


# ---------------- fused MHA kernel: ONE invocation, both batches ----------------
def mha_kernel(xq_ref, xk_ref, xv_ref, mask_ref, hmask_ref,
               wq_ref, wk_ref, wv_ref, wo_ref,
               bq_ref, bk_ref, bv_ref, bo_ref,
               o_ref, *, approx_recip):
    f32 = jnp.float32

    # Q/K/V projections for both batches at once: (B*S, D) x (D, D).
    # 1/sqrt(d_k) is pre-folded into wq / bq.
    q = jnp.dot(xq_ref[...], wq_ref[...], preferred_element_type=f32) + bq_ref[...]
    k = jnp.dot(xk_ref[...], wk_ref[...], preferred_element_type=f32) + bk_ref[...]
    v = jnp.dot(xv_ref[...], wv_ref[...], preferred_element_type=f32) + bv_ref[...]

    hmask = hmask_ref[...]                       # (H*S, D) block-diag head mask

    ctxs = []
    for b in range(B):                           # B=2: static unroll, vreg-aligned slices
        lo = b * S
        q_b = q[lo:lo + S, :]                    # (S, D)
        k_b = k[lo:lo + S, :]
        v_b = v[lo:lo + S, :]

        # q_bd[h*S + i, :] = q_b[i, :] restricted to head h's D_K lanes (sublane stack).
        q_bd = jnp.concatenate([q_b] * H, axis=0) * hmask                     # (H*S, D)

        # All heads' QK^T in ONE MXU pass: scores[h*S+i, j] = q_h[i] . k_h[j] (pre-scaled).
        scores = lax.dot_general(q_bd, k_b, (((1,), (1,)), ((), ())),
                                 preferred_element_type=f32)                  # (H*S, S)

        # masked_fill(mask == 0, -1e9) done in-kernel (vcmp+vsel), broadcast over heads.
        mask_h = jnp.concatenate([mask_ref[b]] * H, axis=0)                   # (H*S, S)
        scores = jnp.where(mask_h == 0, f32(-1e9), scores)

        # Row-wise softmax: each row is one (head, query) pair -> exact per-head max.
        m = jnp.max(scores, axis=-1, keepdims=True)
        e = jnp.exp(scores - m)
        denom = jnp.sum(e, axis=-1, keepdims=True)
        if approx_recip:
            p = e * pl.reciprocal(denom, approx=True)        # EUP slot, ~free
        else:
            p = e / denom                                    # exact path for validation

        # All heads' P@V in ONE MXU pass: res[h*S+i, :] = sum_j p[h*S+i, j] * v_b[j, :].
        res = jnp.dot(p, v_b, preferred_element_type=f32)                     # (H*S, D)

        # Fold heads back onto lanes (== torch transpose(1,2).view(nb, S, h*d_k)):
        # ctx[i, c] = res[head(c)*S + i, c].  Mask once, then sum the H sublane blocks
        # (slices at multiples of 8 are vreg-aligned, i.e. free).
        masked = res * hmask                                                  # (H*S, D)
        ctx = masked[0:S, :]
        for h in range(1, H):
            ctx = ctx + masked[h * S:(h + 1) * S, :]
        ctxs.append(ctx)                                                      # (S, D)

    # Output projection for both batches at once.
    ctx_all = jnp.concatenate(ctxs, axis=0)                                   # (B*S, D)
    out = jnp.dot(ctx_all, wo_ref[...], preferred_element_type=f32) + bo_ref[...]

    for b in range(B):
        o_ref[b] = out[b * S:(b + 1) * S, :]


# ---------------- parameter preparation (done once, outside the hot path) ----------------
def prepare_params(params):
    """Pre-transpose weights to (d_in, d_out); fold 1/sqrt(d_k) into the Q projection."""
    scale = 1.0 / math.sqrt(D_K)
    return {
        "wq": params["w0"].T * scale, "bq": (params["b0"] * scale).reshape(1, D_MODEL),
        "wk": params["w1"].T,         "bk": params["b1"].reshape(1, D_MODEL),
        "wv": params["w2"].T,         "bv": params["b2"].reshape(1, D_MODEL),
        "wo": params["w3"].T,         "bo": params["b3"].reshape(1, D_MODEL),
    }


# ---------------- wrapper: one fused pallas_call, no grid ----------------
@functools.partial(jax.jit, static_argnames=("approx_recip",))
def multi_headed_attention(prep, query, key, value, mask, approx_recip=True):
    """query/key/value: (B, S, D_MODEL) f32; mask: (B, S, S) int32 (1=keep, 0=mask)."""
    nb, s, dm = query.shape
    assert (nb, s, dm) == (B, S, D_MODEL)

    vmem = pl.BlockSpec(memory_space=pltpu.MemorySpace.VMEM)
    kernel = functools.partial(mha_kernel, approx_recip=approx_recip)

    return pl.pallas_call(
        kernel,
        out_shape=jax.ShapeDtypeStruct((nb, s, dm), jnp.float32),
        in_specs=[vmem] * 13,
        out_specs=vmem,
    )(
        # (B,S,D) -> (B*S,D) is a free contiguous view (batch stacked on sublanes).
        query.reshape(nb * s, dm),
        key.reshape(nb * s, dm),
        value.reshape(nb * s, dm),
        mask,                                    # raw int32 mask; converted in-kernel
        jnp.asarray(HEAD_MASK),                  # constant block-diag head mask
        prep["wq"], prep["wk"], prep["wv"], prep["wo"],
        prep["bq"], prep["bk"], prep["bv"], prep["bo"],
    )


# ---------------- init + pure-JAX reference (PyTorch semantics) ----------------
def init_params(key):
    """Deterministic init matching nn.Linear(d_model, d_model) x 4 shapes."""
    params = {}
    bound = 1.0 / math.sqrt(D_MODEL)
    for i in range(4):
        key, kw, kb = jax.random.split(key, 3)
        params[f"w{i}"] = jax.random.uniform(
            kw, (D_MODEL, D_MODEL), jnp.float32, minval=-bound, maxval=bound)
        params[f"b{i}"] = jax.random.uniform(
            kb, (D_MODEL,), jnp.float32, minval=-bound, maxval=bound)
    return params


def mha_reference(params, query, key, value, mask):
    nb = query.shape[0]

    def proj(i, x):
        y = x.reshape(-1, D_MODEL) @ params[f"w{i}"].T + params[f"b{i}"]
        return y.reshape(nb, -1, H, D_K).transpose(0, 2, 1, 3)       # (B, H, S, D_K)

    q, k, v = proj(0, query), proj(1, key), proj(2, value)
    scores = jnp.einsum("bhqd,bhkd->bhqk", q, k) / math.sqrt(D_K)
    scores = jnp.where(mask[:, None, :, :] == 0, -1e9, scores)
    p = jax.nn.softmax(scores, axis=-1)
    x = jnp.einsum("bhqk,bhkd->bhqd", p, v)
    x = x.transpose(0, 2, 1, 3).reshape(nb, -1, D_MODEL)
    return x.reshape(-1, D_MODEL) @ params["w3"].T + params["b3"]


if __name__ == "__main__":
    root = jax.random.PRNGKey(0)
    kp, kq, kk, kv = jax.random.split(root, 4)

    params = init_params(kp)
    prep = prepare_params(params)

    query = jax.random.normal(kq, (B, S, D_MODEL), jnp.float32)
    key_in = jax.random.normal(kk, (B, S, D_MODEL), jnp.float32)
    value = jax.random.normal(kv, (B, S, D_MODEL), jnp.float32)

    # causal mask (B, S, S): 1 = keep, 0 = masked
    mask = jnp.tril(jnp.ones((S, S), jnp.int32))[None, :, :].repeat(B, axis=0)

    ref = mha_reference(params, query, key_in, value, mask).reshape(B, S, D_MODEL)

    # 1) exact-reciprocal pass: tight numerical validation against the f32 reference
    out_exact = multi_headed_attention(prep, query, key_in, value, mask,
                                       approx_recip=False)
    jax.block_until_ready(out_exact)
    assert out_exact.shape == (B, S, D_MODEL)
    assert bool(jnp.allclose(out_exact, ref, atol=1e-4, rtol=1e-4))

    # 2) production pass: approximate EUP reciprocal in the softmax normalisation
    out = multi_headed_attention(prep, query, key_in, value, mask, approx_recip=True)
    jax.block_until_ready(out)
    assert out.shape == (B, S, D_MODEL)
    assert bool(jnp.allclose(out, ref, atol=2e-2, rtol=2e-2))

    print("KERNEL_OK")
</pallas_src>

<mosaic_0001>
module attributes {stable_mosaic.version = 11 : i64} {
  func.func @mha_kernel(%arg0: memref<16x32xf32, #tpu.memory_space<vmem>>, %arg1: memref<16x32xf32, #tpu.memory_space<vmem>>, %arg2: memref<16x32xf32, #tpu.memory_space<vmem>>, %arg3: memref<2x8x8xi32, #tpu.memory_space<vmem>>, %arg4: memref<32x32xf32, #tpu.memory_space<vmem>>, %arg5: memref<32x32xf32, #tpu.memory_space<vmem>>, %arg6: memref<32x32xf32, #tpu.memory_space<vmem>>, %arg7: memref<32x32xf32, #tpu.memory_space<vmem>>, %arg8: memref<32x32xf32, #tpu.memory_space<vmem>>, %arg9: memref<1x32xf32, #tpu.memory_space<vmem>>, %arg10: memref<1x32xf32, #tpu.memory_space<vmem>>, %arg11: memref<1x32xf32, #tpu.memory_space<vmem>>, %arg12: memref<1x32xf32, #tpu.memory_space<vmem>>, %arg13: memref<2x8x32xf32, #tpu.memory_space<vmem>>) attributes {dimension_semantics = [], scalar_prefetch = 0 : i64, scratch_operands = 0 : i64, tpu.core_type = #tpu.core_type<tc>} {
    %c0 = arith.constant 0 : index
    %c0_0 = arith.constant 0 : index
    %0 = vector.load %arg0[%c0, %c0_0] : memref<16x32xf32, #tpu.memory_space<vmem>>, vector<16x32xf32>
    %c0_1 = arith.constant 0 : index
    %c0_2 = arith.constant 0 : index
    %1 = vector.load %arg5[%c0_1, %c0_2] : memref<32x32xf32, #tpu.memory_space<vmem>>, vector<32x32xf32>
    %cst = arith.constant dense<0.000000e+00> : vector<16x32xf32>
    %2 = tpu.matmul %0, %1, %cst {dimension_numbers = #tpu.dot_dimension_numbers<[1], [0], [0], [1], [0, 0, 1, 1], [], []>} : vector<16x32xf32>, vector<32x32xf32>, vector<16x32xf32> -> vector<16x32xf32>
    %c0_3 = arith.constant 0 : index
    %c0_4 = arith.constant 0 : index
    %3 = vector.load %arg9[%c0_3, %c0_4] : memref<1x32xf32, #tpu.memory_space<vmem>>, vector<1x32xf32>
    %4 = vector.broadcast %3 : vector<1x32xf32> to vector<16x32xf32>
    %5 = arith.addf %2, %4 : vector<16x32xf32>
    %c0_5 = arith.constant 0 : index
    %c0_6 = arith.constant 0 : index
    %6 = vector.load %arg1[%c0_5, %c0_6] : memref<16x32xf32, #tpu.memory_space<vmem>>, vector<16x32xf32>
    %c0_7 = arith.constant 0 : index
    %c0_8 = arith.constant 0 : index
    %7 = vector.load %arg6[%c0_7, %c0_8] : memref<32x32xf32, #tpu.memory_space<vmem>>, vector<32x32xf32>
    %cst_9 = arith.constant dense<0.000000e+00> : vector<16x32xf32>
    %8 = tpu.matmul %6, %7, %cst_9 {dimension_numbers = #tpu.dot_dimension_numbers<[1], [0], [0], [1], [0, 0, 1, 1], [], []>} : vector<16x32xf32>, vector<32x32xf32>, vector<16x32xf32> -> vector<16x32xf32>
    %c0_10 = arith.constant 0 : index
    %c0_11 = arith.constant 0 : index
    %9 = vector.load %arg10[%c0_10, %c0_11] : memref<1x32xf32, #tpu.memory_space<vmem>>, vector<1x32xf32>
    %10 = vector.broadcast %9 : vector<1x32xf32> to vector<16x32xf32>
    %11 = arith.addf %8, %10 : vector<16x32xf32>
    %c0_12 = arith.constant 0 : index
    %c0_13 = arith.constant 0 : index
    %12 = vector.load %arg2[%c0_12, %c0_13] : memref<16x32xf32, #tpu.memory_space<vmem>>, vector<16x32xf32>
    %c0_14 = arith.constant 0 : index
    %c0_15 = arith.constant 0 : index
    %13 = vector.load %arg7[%c0_14, %c0_15] : memref<32x32xf32, #tpu.memory_space<vmem>>, vector<32x32xf32>
    %cst_16 = arith.constant dense<0.000000e+00> : vector<16x32xf32>
    %14 = tpu.matmul %12, %13, %cst_16 {dimension_numbers = #tpu.dot_dimension_numbers<[1], [0], [0], [1], [0, 0, 1, 1], [], []>} : vector<16x32xf32>, vector<32x32xf32>, vector<16x32xf32> -> vector<16x32xf32>
    %c0_17 = arith.constant 0 : index
    %c0_18 = arith.constant 0 : index
    %15 = vector.load %arg11[%c0_17, %c0_18] : memref<1x32xf32, #tpu.memory_space<vmem>>, vector<1x32xf32>
    %16 = vector.broadcast %15 : vector<1x32xf32> to vector<16x32xf32>
    %17 = arith.addf %14, %16 : vector<16x32xf32>
    %c0_19 = arith.constant 0 : index
    %c0_20 = arith.constant 0 : index
    %18 = vector.load %arg4[%c0_19, %c0_20] : memref<32x32xf32, #tpu.memory_space<vmem>>, vector<32x32xf32>
    %19 = vector.extract_strided_slice %5 {offsets = [0, 0], sizes = [8, 32], strides = [1, 1]} : vector<16x32xf32> to vector<8x32xf32>
    %20 = vector.extract_strided_slice %11 {offsets = [0, 0], sizes = [8, 32], strides = [1, 1]} : vector<16x32xf32> to vector<8x32xf32>
    %21 = vector.extract_strided_slice %17 {offsets = [0, 0], sizes = [8, 32], strides = [1, 1]} : vector<16x32xf32> to vector<8x32xf32>
    %22 = tpu.concatenate %19, %19, %19, %19 in 0 : vector<8x32xf32>, vector<8x32xf32>, vector<8x32xf32>, vector<8x32xf32> -> vector<32x32xf32>
    %23 = arith.mulf %22, %18 : vector<32x32xf32>
    %cst_21 = arith.constant dense<0.000000e+00> : vector<32x8xf32>
    %24 = tpu.matmul %23, %20, %cst_21 {dimension_numbers = #tpu.dot_dimension_numbers<[1], [1], [0], [0], [0, 0, 1, 0], [], []>} : vector<32x32xf32>, vector<8x32xf32>, vector<32x8xf32> -> vector<32x8xf32>
    %c0_22 = arith.constant 0 : index
    %c0_23 = arith.constant 0 : index
    %c0_24 = arith.constant 0 : index
    %25 = vector.load %arg3[%c0_22, %c0_23, %c0_24] : memref<2x8x8xi32, #tpu.memory_space<vmem>>, vector<1x8x8xi32>
    %26 = vector.shape_cast %25 : vector<1x8x8xi32> to vector<8x8xi32>
    %27 = tpu.concatenate %26, %26, %26, %26 in 0 : vector<8x8xi32>, vector<8x8xi32>, vector<8x8xi32>, vector<8x8xi32> -> vector<32x8xi32>
    %c0_i32 = arith.constant 0 : i32
    %28 = vector.broadcast %c0_i32 : i32 to vector<32x8xi32>
    %29 = arith.cmpi eq, %27, %28 : vector<32x8xi32>
    %cst_25 = arith.constant -1.000000e+09 : f32
    %30 = vector.broadcast %cst_25 : f32 to vector<32x8xf32>
    %31 = arith.select %29, %30, %24 : vector<32x8xi1>, vector<32x8xf32>
    %cst_26 = arith.constant dense<0xFF800000> : vector<32xf32>
    %32 = vector.multi_reduction <maximumf>, %31, %cst_26 [1] : vector<32x8xf32> to vector<32xf32>
    %33 = vector.shape_cast %32 : vector<32xf32> to vector<32x1xf32>
    %34 = vector.broadcast %33 : vector<32x1xf32> to vector<32x8xf32>
    %35 = arith.subf %31, %34 : vector<32x8xf32>
    %36 = math.exp %35 : vector<32x8xf32>
    %cst_27 = arith.constant dense<0.000000e+00> : vector<32xf32>
    %37 = vector.multi_reduction <add>, %36, %cst_27 [1] : vector<32x8xf32> to vector<32xf32>
    %38 = vector.shape_cast %37 : vector<32xf32> to vector<32x1xf32>
    %39 = vector.broadcast %38 : vector<32x1xf32> to vector<32x8xf32>
    %40 = arith.divf %36, %39 : vector<32x8xf32>
    %cst_28 = arith.constant dense<0.000000e+00> : vector<32x32xf32>
    %41 = tpu.matmul %40, %21, %cst_28 {dimension_numbers = #tpu.dot_dimension_numbers<[1], [0], [0], [1], [0, 0, 1, 1], [], []>} : vector<32x8xf32>, vector<8x32xf32>, vector<32x32xf32> -> vector<32x32xf32>
    %42 = arith.mulf %41, %18 : vector<32x32xf32>
    %43 = vector.extract_strided_slice %42 {offsets = [0, 0], sizes = [8, 32], strides = [1, 1]} : vector<32x32xf32> to vector<8x32xf32>
    %44 = vector.extract_strided_slice %42 {offsets = [8, 0], sizes = [8, 32], strides = [1, 1]} : vector<32x32xf32> to vector<8x32xf32>
    %45 = arith.addf %43, %44 : vector<8x32xf32>
    %46 = vector.extract_strided_slice %42 {offsets = [16, 0], sizes = [8, 32], strides = [1, 1]} : vector<32x32xf32> to vector<8x32xf32>
    %47 = arith.addf %45, %46 : vector<8x32xf32>
    %48 = vector.extract_strided_slice %42 {offsets = [24, 0], sizes = [8, 32], strides = [1, 1]} : vector<32x32xf32> to vector<8x32xf32>
    %49 = arith.addf %47, %48 : vector<8x32xf32>
    %50 = vector.extract_strided_slice %5 {offsets = [8, 0], sizes = [8, 32], strides = [1, 1]} : vector<16x32xf32> to vector<8x32xf32>
    %51 = vector.extract_strided_slice %11 {offsets = [8, 0], sizes = [8, 32], strides = [1, 1]} : vector<16x32xf32> to vector<8x32xf32>
    %52 = vector.extract_strided_slice %17 {offsets = [8, 0], sizes = [8, 32], strides = [1, 1]} : vector<16x32xf32> to vector<8x32xf32>
    %53 = tpu.concatenate %50, %50, %50, %50 in 0 : vector<8x32xf32>, vector<8x32xf32>, vector<8x32xf32>, vector<8x32xf32> -> vector<32x32xf32>
    %54 = arith.mulf %53, %18 : vector<32x32xf32>
    %cst_29 = arith.constant dense<0.000000e+00> : vector<32x8xf32>
    %55 = tpu.matmul %54, %51, %cst_29 {dimension_numbers = #tpu.dot_dimension_numbers<[1], [1], [0], [0], [0, 0, 1, 0], [], []>} : vector<32x32xf32>, vector<8x32xf32>, vector<32x8xf32> -> vector<32x8xf32>
    %c1 = arith.constant 1 : index
    %c0_30 = arith.constant 0 : index
    %c0_31 = arith.constant 0 : index
    %56 = vector.load %arg3[%c1, %c0_30, %c0_31] : memref<2x8x8xi32, #tpu.memory_space<vmem>>, vector<1x8x8xi32>
    %57 = vector.shape_cast %56 : vector<1x8x8xi32> to vector<8x8xi32>
    %58 = tpu.concatenate %57, %57, %57, %57 in 0 : vector<8x8xi32>, vector<8x8xi32>, vector<8x8xi32>, vector<8x8xi32> -> vector<32x8xi32>
    %c0_i32_32 = arith.constant 0 : i32
    %59 = vector.broadcast %c0_i32_32 : i32 to vector<32x8xi32>
    %60 = arith.cmpi eq, %58, %59 : vector<32x8xi32>
    %cst_33 = arith.constant -1.000000e+09 : f32
    %61 = vector.broadcast %cst_33 : f32 to vector<32x8xf32>
    %62 = arith.select %60, %61, %55 : vector<32x8xi1>, vector<32x8xf32>
    %cst_34 = arith.constant dense<0xFF800000> : vector<32xf32>
    %63 = vector.multi_reduction <maximumf>, %62, %cst_34 [1] : vector<32x8xf32> to vector<32xf32>
    %64 = vector.shape_cast %63 : vector<32xf32> to vector<32x1xf32>
    %65 = vector.broadcast %64 : vector<32x1xf32> to vector<32x8xf32>
    %66 = arith.subf %62, %65 : vector<32x8xf32>
    %67 = math.exp %66 : vector<32x8xf32>
    %cst_35 = arith.constant dense<0.000000e+00> : vector<32xf32>
    %68 = vector.multi_reduction <add>, %67, %cst_35 [1] : vector<32x8xf32> to vector<32xf32>
    %69 = vector.shape_cast %68 : vector<32xf32> to vector<32x1xf32>
    %70 = vector.broadcast %69 : vector<32x1xf32> to vector<32x8xf32>
    %71 = arith.divf %67, %70 : vector<32x8xf32>
    %cst_36 = arith.constant dense<0.000000e+00> : vector<32x32xf32>
    %72 = tpu.matmul %71, %52, %cst_36 {dimension_numbers = #tpu.dot_dimension_numbers<[1], [0], [0], [1], [0, 0, 1, 1], [], []>} : vector<32x8xf32>, vector<8x32xf32>, vector<32x32xf32> -> vector<32x32xf32>
    %73 = arith.mulf %72, %18 : vector<32x32xf32>
    %74 = vector.extract_strided_slice %73 {offsets = [0, 0], sizes = [8, 32], strides = [1, 1]} : vector<32x32xf32> to vector<8x32xf32>
    %75 = vector.extract_strided_slice %73 {offsets = [8, 0], sizes = [8, 32], strides = [1, 1]} : vector<32x32xf32> to vector<8x32xf32>
    %76 = arith.addf %74, %75 : vector<8x32xf32>
    %77 = vector.extract_strided_slice %73 {offsets = [16, 0], sizes = [8, 32], strides = [1, 1]} : vector<32x32xf32> to vector<8x32xf32>
    %78 = arith.addf %76, %77 : vector<8x32xf32>
    %79 = vector.extract_strided_slice %73 {offsets = [24, 0], sizes = [8, 32], strides = [1, 1]} : vector<32x32xf32> to vector<8x32xf32>
    %80 = arith.addf %78, %79 : vector<8x32xf32>
    %81 = tpu.concatenate %49, %80 in 0 : vector<8x32xf32>, vector<8x32xf32> -> vector<16x32xf32>
    %c0_37 = arith.constant 0 : index
    %c0_38 = arith.constant 0 : index
    %82 = vector.load %arg8[%c0_37, %c0_38] : memref<32x32xf32, #tpu.memory_space<vmem>>, vector<32x32xf32>
    %cst_39 = arith.constant dense<0.000000e+00> : vector<16x32xf32>
    %83 = tpu.matmul %81, %82, %cst_39 {dimension_numbers = #tpu.dot_dimension_numbers<[1], [0], [0], [1], [0, 0, 1, 1], [], []>} : vector<16x32xf32>, vector<32x32xf32>, vector<16x32xf32> -> vector<16x32xf32>
    %c0_40 = arith.constant 0 : index
    %c0_41 = arith.constant 0 : index
    %84 = vector.load %arg12[%c0_40, %c0_41] : memref<1x32xf32, #tpu.memory_space<vmem>>, vector<1x32xf32>
    %85 = vector.broadcast %84 : vector<1x32xf32> to vector<16x32xf32>
    %86 = arith.addf %83, %85 : vector<16x32xf32>
    %87 = vector.extract_strided_slice %86 {offsets = [0, 0], sizes = [8, 32], strides = [1, 1]} : vector<16x32xf32> to vector<8x32xf32>
    %c0_42 = arith.constant 0 : index
    %c0_43 = arith.constant 0 : index
    %c0_44 = arith.constant 0 : index
    %88 = vector.load %arg13[%c0_42, %c0_43, %c0_44] : memref<2x8x32xf32, #tpu.memory_space<vmem>>, vector<1x8x32xf32>
    %89 = vector.shape_cast %88 : vector<1x8x32xf32> to vector<8x32xf32>
    %90 = vector.shape_cast %87 : vector<8x32xf32> to vector<1x8x32xf32>
    tpu.vector_store %arg13[%c0_42, %c0_43, %c0_44], %90 {strides = array<i32>} : memref<2x8x32xf32, #tpu.memory_space<vmem>>, vector<1x8x32xf32>,
    %91 = vector.extract_strided_slice %86 {offsets = [8, 0], sizes = [8, 32], strides = [1, 1]} : vector<16x32xf32> to vector<8x32xf32>
    %c1_45 = arith.constant 1 : index
    %c0_46 = arith.constant 0 : index
    %c0_47 = arith.constant 0 : index
    %92 = vector.load %arg13[%c1_45, %c0_46, %c0_47] : memref<2x8x32xf32, #tpu.memory_space<vmem>>, vector<1x8x32xf32>
    %93 = vector.shape_cast %92 : vector<1x8x32xf32> to vector<8x32xf32>
    %94 = vector.shape_cast %91 : vector<8x32xf32> to vector<1x8x32xf32>
    tpu.vector_store %arg13[%c1_45, %c0_46, %c0_47], %94 {strides = array<i32>} : memref<2x8x32xf32, #tpu.memory_space<vmem>>, vector<1x8x32xf32>,
    return
  }
}

</mosaic_0001>

<bundles_post_ra>
// kernel: multi_headed_attention.1
= control target key start
LH: loop header
LB: loop body
LE: loop exit
PB: predicated region body
PF: predicated region fallthrough
CT: control target
= control target key end

     0   :  { %18 = vsyncpa [#allocation3], 0  ;;  %s1795_s0 = inlined_call_operand.vmem [shape: f32[16,32], index: 0, kind: input, shape index: {}]   ;;  %s1796_s1 = inlined_call_operand.hbm [shape: f32[16,32], index: 1, kind: input, shape index: {}]   ;;  %s1797_s2 = inlined_call_operand.hbm [shape: f32[16,32], index: 2, kind: input, shape index: {}]   ;;  %s1798_s3 = inlined_call_operand.hbm [shape: s32[2,8,8], index: 3, kind: input, shape index: {}]   ;;  %s1799_s4 = inlined_call_operand.vmem [shape: f32[32,32], index: 4, kind: input, shape index: {}]   ;;  %s1800_s5 = inlined_call_operand.hbm [shape: f32[32,32], index: 5, kind: input, shape index: {}]   ;;  %s1801_s6 = inlined_call_operand.hbm [shape: f32[32,32], index: 6, kind: input, shape index: {}]   ;;  %s1802_s7 = inlined_call_operand.hbm [shape: f32[32,32], index: 7, kind: input, shape index: {}]   ;;  %s1803_s8 = inlined_call_operand.hbm [shape: f32[32,32], index: 8, kind: input, shape index: {}]   ;;  %s1804_s9 = inlined_call_operand.vmem [shape: f32[1,32], index: 9, kind: input, shape index: {}]   ;;  %s1805_s10 = inlined_call_operand.vmem [shape: f32[1,32], index: 10, kind: input, shape index: {}]   ;;  %s1806_s11 = inlined_call_operand.vmem [shape: f32[1,32], index: 11, kind: input, shape index: {}]   ;;  %s1807_s12 = inlined_call_operand.vmem [shape: f32[1,32], index: 12, kind: input, shape index: {}]   ;;  %s1808_s13 = inlined_call_operand.hbm [shape: f32[2,8,32], index: 13, kind: output, shape index: {}]  }
   0x1   :  { %19 = vsyncpa [#allocation6], 0 }
   0x2   :  { %20 = vsyncpa [#allocation9], 0 }
   0x3   :  { %21 = vsyncpa [#allocation12], 0 }
   0x4   :  { %22 = vsyncpa [#allocation4], 0  ;;  %s1470_s25 = smov [#allocation5]   ;;  %s1471_s27 = smov [#allocation8]  }
   0x5   :  { %s42_s26 = sshll.u32 %s1470_s25, 4  ;;  %s68_s28 = sshll.u32 %s1471_s27, 4  ;;  %s43_s26 = int_to_ptr.vmem [resolvable:$true] %s42_s26  ;;  %s1550_s28 = int_to_ptr.vmem [resolvable:$true] %s68_s28 }
   0x6   :  { %s1284_s14 = scalar_lea.hbm %s1797_s2, 256 }
   0x7   :  { %p1285_p0 = scmp.ne.s32.totalorder %s1797_s2, %s1284_s14  ;;  %p1288_p1 = scmp.lt.u32.totalorder %s1284_s14, %s1797_s2 }
   0x9   :  { %p1290_p2 = pnand %p1288_p1, %p1285_p0 }
   0xb   :  { %1293 = shalt.err (!%p1290_p2)
}
   0xc   :  { %s1294_s19 = scalar_lea.vmem %s43_s26, 256  ;;  %p1299_p4 = scmp.lt.s32.totalorder %s43_s26, %s43_s26 }
   0xd   :  { %p1295_p3 = scmp.ne.s32.totalorder %s43_s26, %s1294_s19  ;;  %p1300_p5 = scmp.lt.s32.totalorder %s1294_s19, %s1294_s19 }
   0xf   :  { %p1301_p6 = por %p1300_p5, %p1299_p4 }
  0x11   :  { %p1302_p7 = pnand %p1301_p6, %p1295_p3 }
  0x13   :  { %1305 = shalt.err (!%p1302_p7)
}
  0x14   :  { %s1472_s20 = smov 128   ;;  %s1473_s21 = smov 8  }
  0x15   :  { %48 = dma.hbm_to_vmem [thread:$0]  %s1797_s2, 256, %s43_s26, [#allocation6], %s1472_s20, %s1472_s20, %s1473_s21  }
  0x16   :  { %s1306_s27 = scalar_lea.hbm %s1800_s5, 512 }
  0x17   :  { %p1307_p8 = scmp.ne.s32.totalorder %s1800_s5, %s1306_s27  ;;  %p1310_p9 = scmp.lt.u32.totalorder %s1306_s27, %s1800_s5 }
  0x19   :  { %p1312_p10 = pnand %p1310_p9, %p1307_p8 }
  0x1b   :  { %1315 = shalt.err (!%p1312_p10)
}
  0x1c   :  { %s1316_s16 = scalar_lea.vmem %s1550_s28, 512  ;;  %p1321_p12 = scmp.lt.s32.totalorder %s1550_s28, %s1550_s28 }
  0x1d   :  { %p1317_p11 = scmp.ne.s32.totalorder %s1550_s28, %s1316_s16  ;;  %p1322_p13 = scmp.lt.s32.totalorder %s1316_s16, %s1316_s16 }
  0x1f   :  { %p1323_p0 = por %p1322_p13, %p1321_p12 }
  0x21   :  { %p1324_p1 = pnand %p1323_p0, %p1317_p11 }
  0x23   :  { %1327 = shalt.err (!%p1324_p1)
}
  0x24   :  { %74 = dma.hbm_to_vmem [thread:$0]  %s1800_s5, 512, %s1550_s28, [#allocation9], %s1472_s20, %s1472_s20, %s1473_s21  }
  0x25   :  { %s1474_s17 = smov [#allocation11]   ;;  %s1475_s19 = smov [#allocation2]  }
  0x26   :  { %s92_s18 = sshll.u32 %s1474_s17, 4  ;;  %s30_s22 = sshll.u32 %s1475_s19, 4  ;;  %s93_s18 = int_to_ptr.vmem [resolvable:$true] %s92_s18  ;;  %s1587_s22 = int_to_ptr.vmem [resolvable:$true] %s30_s22 }
  0x27   :  { %s1328_s25 = scalar_lea.hbm %s1802_s7, 512 }
  0x28   :  { %p1329_p2 = scmp.ne.s32.totalorder %s1802_s7, %s1328_s25  ;;  %p1332_p3 = scmp.lt.u32.totalorder %s1328_s25, %s1802_s7 }
  0x2a   :  { %p1334_p4 = pnand %p1332_p3, %p1329_p2 }
  0x2c   :  { %1337 = shalt.err (!%p1334_p4)
}
  0x2d   :  { %s1338_s5 = scalar_lea.vmem %s93_s18, 512  ;;  %p1343_p6 = scmp.lt.s32.totalorder %s93_s18, %s93_s18 }
  0x2e   :  { %p1339_p5 = scmp.ne.s32.totalorder %s93_s18, %s1338_s5  ;;  %p1344_p7 = scmp.lt.s32.totalorder %s1338_s5, %s1338_s5 }
  0x30   :  { %p1345_p8 = por %p1344_p7, %p1343_p6 }
  0x32   :  { %p1346_p9 = pnand %p1345_p8, %p1339_p5 }
  0x34   :  { %1349 = shalt.err (!%p1346_p9)
}
  0x35   :  { %98 = dma.hbm_to_vmem [thread:$0]  %s1802_s7, 512, %s93_s18, [#allocation12], %s1472_s20, %s1472_s20, %s1473_s21  }
  0x36   :  { %s1350_s26 = scalar_lea.hbm %s1796_s1, 256 }
  0x37   :  { %p1351_p10 = scmp.ne.s32.totalorder %s1796_s1, %s1350_s26  ;;  %p1354_p11 = scmp.lt.u32.totalorder %s1350_s26, %s1796_s1 }
  0x39   :  { %p1356_p12 = pnand %p1354_p11, %p1351_p10 }
  0x3b   :  { %1359 = shalt.err (!%p1356_p12)
}
  0x3c   :  { %s1360_s25 = scalar_lea.vmem %s1587_s22, 256  ;;  %p1365_p0 = scmp.lt.s32.totalorder %s1587_s22, %s1587_s22 }
  0x3d   :  { %p1361_p13 = scmp.ne.s32.totalorder %s1587_s22, %s1360_s25  ;;  %p1366_p1 = scmp.lt.s32.totalorder %s1360_s25, %s1360_s25 }
  0x3f   :  { %p1367_p2 = por %p1366_p1, %p1365_p0 }
  0x41   :  { %p1368_p3 = pnand %p1367_p2, %p1361_p13 }
  0x43   :  { %1371 = shalt.err (!%p1368_p3)
}
  0x44   :  { %36 = dma.hbm_to_vmem [thread:$0]  %s1796_s1, 256, %s1587_s22, [#allocation3], %s1472_s20, %s1472_s20, %s1473_s21  }
  0x45   :  { %s1476_s27 = smov [#allocation7]   ;;  %s1477_s30 = smov [#allocation10]  }
  0x46   :  { %s54_s29 = sshll.u32 %s1476_s27, 4  ;;  %s80_s14 = sshll.u32 %s1477_s30, 4  ;;  %s55_s29 = int_to_ptr.vmem [resolvable:$true] %s54_s29  ;;  %s1624_s14 = int_to_ptr.vmem [resolvable:$true] %s80_s14 }
  0x47   :  { %s1372_s15 = scalar_lea.hbm %s1798_s3, 256 }
  0x48   :  { %p1373_p4 = scmp.ne.s32.totalorder %s1798_s3, %s1372_s15  ;;  %p1376_p5 = scmp.lt.u32.totalorder %s1372_s15, %s1798_s3 }
  0x4a   :  { %p1378_p6 = pnand %p1376_p5, %p1373_p4 }
  0x4c   :  { %1381 = shalt.err (!%p1378_p6)
}
  0x4d   :  { %s1382_s1 = scalar_lea.vmem %s55_s29, 256  ;;  %p1387_p8 = scmp.lt.s32.totalorder %s55_s29, %s55_s29 }
  0x4e   :  { %p1383_p7 = scmp.ne.s32.totalorder %s55_s29, %s1382_s1  ;;  %p1388_p9 = scmp.lt.s32.totalorder %s1382_s1, %s1382_s1 }
  0x50   :  { %p1389_p10 = por %p1388_p9, %p1387_p8 }
  0x52   :  { %p1390_p11 = pnand %p1389_p10, %p1383_p7 }
  0x54   :  { %1393 = shalt.err (!%p1390_p11)
}
  0x55   :  { %60 = dma.hbm_to_vmem [thread:$0]  %s1798_s3, 256, %s55_s29, [#allocation6], %s1472_s20, %s1472_s20, %s1473_s21  }
  0x56   :  { %s1394_s25 = scalar_lea.hbm %s1801_s6, 512 }
  0x57   :  { %p1395_p12 = scmp.ne.s32.totalorder %s1801_s6, %s1394_s25  ;;  %p1398_p13 = scmp.lt.u32.totalorder %s1394_s25, %s1801_s6 }
  0x59   :  { %p1400_p0 = pnand %p1398_p13, %p1395_p12 }
  0x5b   :  { %1403 = shalt.err (!%p1400_p0)
}
  0x5c   :  { %s1404_s5 = scalar_lea.vmem %s1624_s14, 512  ;;  %p1409_p2 = scmp.lt.s32.totalorder %s1624_s14, %s1624_s14 }
  0x5d   :  { %p1405_p1 = scmp.ne.s32.totalorder %s1624_s14, %s1404_s5  ;;  %p1410_p3 = scmp.lt.s32.totalorder %s1404_s5, %s1404_s5 }
  0x5f   :  { %p1411_p4 = por %p1410_p3, %p1409_p2 }
  0x61   :  { %p1412_p5 = pnand %p1411_p4, %p1405_p1 }
  0x63   :  { %1415 = shalt.err (!%p1412_p5)
}
  0x64   :  { %86 = dma.hbm_to_vmem [thread:$0]  %s1801_s6, 512, %s1624_s14, [#allocation9], %s1472_s20, %s1472_s20, %s1473_s21  }
  0x65   :  { %s1478_s28 = smov [#allocation13]   ;;  %s1416_s26 = scalar_lea.hbm %s1803_s8, 512 }
  0x66   :  { %s104_s15 = sshll.u32 %s1478_s28, 4  ;;  %p1417_p6 = scmp.ne.s32.totalorder %s1803_s8, %s1416_s26  ;;  %s105_s15 = int_to_ptr.vmem [resolvable:$true] %s104_s15 }
  0x67   :  { %p1420_p7 = scmp.lt.u32.totalorder %s1416_s26, %s1803_s8 }
  0x69   :  { %p1422_p8 = pnand %p1420_p7, %p1417_p6 }
  0x6b   :  { %1425 = shalt.err (!%p1422_p8)
}
  0x6c   :  { %s1426_s23 = scalar_lea.vmem %s105_s15, 512  ;;  %p1431_p10 = scmp.lt.s32.totalorder %s105_s15, %s105_s15 }
  0x6d   :  { %p1427_p9 = scmp.ne.s32.totalorder %s105_s15, %s1426_s23  ;;  %p1432_p11 = scmp.lt.s32.totalorder %s1426_s23, %s1426_s23 }
  0x6f   :  { %p1433_p12 = por %p1432_p11, %p1431_p10 }
  0x71   :  { %p1434_p13 = pnand %p1433_p12, %p1427_p9 }
  0x73   :  { %1437 = shalt.err (!%p1434_p13)
}
  0x74   :  { %110 = dma.hbm_to_vmem [thread:$0]  %s1803_s8, 512, %s105_s15, [#allocation12], %s1472_s20, %s1472_s20, %s1473_s21  }
  0x75   :  { %1460 = dma.done.wait [#allocation3], 256  }
  0x76   :  { %1461 = vsyncadd [#allocation3], 4294967040 }
  0x77   :  { %1462 = dma.done.wait [#allocation6], 512  }
  0x78   :  { %1463 = vsyncadd [#allocation6], 4294966784 }
  0x79   :  { %1464 = dma.done.wait [#allocation9], 1024  }
  0x7a   :  { %1465 = vsyncadd [#allocation9], 4294966272 }
  0x7b   :  { %1466 = dma.done.wait [#allocation12], 1024  }
  0x7c   :  { %1467 = vsyncadd [#allocation12], 4294966272  ;;  %v237_v0 = vld [vmem:[#allocation10] sm:$0xff]  ;;  %v238_v1 = vld [vmem:[#allocation10 + $0x8] sm:$0xff]  ;;  %vm153_vm0 = vcmask 261120   ;;  %vm537_vm2 = vcmask 64512  }
  0x7d   :  { %v142_v2 = vld [vmem:[#allocation8] sm:$0xff]  ;;  %v1218_v3 = vpack.c.bf16 %v238_v1, %v237_v0  ;;  %v143_v4 = vld [vmem:[#allocation8 + $0x8] sm:$0xff]  ;;  %v239_v5 = vld [vmem:[#allocation10 + $0x10] sm:$0xff]  ;;  %s1479_s17 = smov [#allocation14]  }
  0x7e   :  { %v240_v6 = vld [vmem:[#allocation10 + $0x18] sm:$0xff]  ;;  %v1210_v7 = vpack.c.bf16 %v143_v4, %v142_v2  ;;  %v144_v9 = vld [vmem:[#allocation8 + $0x10] sm:$0xff]  ;;  %v1706_v27 = vld [vmem:[%s1799_s4 + $0x10] sm:$0xff]  ;;  %s1045_s1 = sshll.u32 %s1479_s17, 4  ;;  %s1046_s1 = int_to_ptr.vmem [resolvable:$true] %s1045_s1 }
  0x7f   :  { %v1222_v8 = vpack.c.bf16 %v240_v6, %v239_v5  ;;  %v145_v10 = vld [vmem:[#allocation8 + $0x18] sm:$0xff]  ;;  %v235_v11 = vld [vmem:[#allocation2] sm:$0xff]  ;;  %1219 = vmatprep.subr.bf16.mxu1 %v1218_v3  ;;  %v1717_v32 = vld [vmem:[%s1799_s4 + $0x18] sm:$0xff]  ;;  %s1438_s22 = scalar_lea.vmem %s1046_s1, 256  ;;  %p1443_p1 = scmp.lt.s32.totalorder %s1046_s1, %s1046_s1 }
  0x80   :  { %v1214_v12 = vpack.c.bf16 %v145_v10, %v144_v9  ;;  %1153 = vmatprep.mubr.msk.f32.mxu1 %vm153_vm0, %v235_v11  ;;  %v140_v13 = vld [vmem:[%s1795_s0] sm:$0xff]  ;;  %1211 = vmatprep.subr.bf16.mxu0 %v1210_v7  ;;  %v236_v14 = vld [vmem:[#allocation2 + $0x8] sm:$0xff]  ;;  %v331_v38 = vld [vmem:[#allocation11] sm:$0xff]  ;;  %p1439_p0 = scmp.ne.s32.totalorder %s1046_s1, %s1438_s22  ;;  %p1444_p2 = scmp.lt.s32.totalorder %s1438_s22, %s1438_s22 }
  0x81   :  { %1221 = vmatpush3.bf16.msra.mxu1 %v1218_v3  ;;  %1213 = vmatpush3.bf16.msra.mxu0 %v1210_v7  ;;  %v141_v15 = vld [vmem:[%s1795_s0 + $0x8] sm:$0xff]  ;;  %v1063_v16 = vld [vmem:[%s1805_s10] ss:$0 sm:$0xff]  ;;  %v332_v39 = vld [vmem:[#allocation11 + $0x8] sm:$0xff] }
  0x82   :  { %1223 = vmatprep.subr.bf16.mxu1 %v1222_v8  ;;  %1215 = vmatprep.subr.bf16.mxu0 %v1214_v12  ;;  %v1060_v18 = vld [vmem:[%s1804_s9] ss:$0 sm:$0xff]  ;;  %v1700_v24 = vld [vmem:[%s1799_s4 + $0x8] sm:$0xff]  ;;  %v1226_v41 = vpack.c.bf16 %v332_v39, %v331_v38  ;;  %v329_v43 = vld [vmem:[#allocation5] sm:$0xff]  ;;  %p1445_p3 = por %p1444_p2, %p1443_p1 }
  0x83   :  { %1142 = vmatprep.mubr.msk.f32.mxu0 %vm153_vm0, %v140_v13  ;;  %v1695_v23 = vld [vmem:[%s1799_s4] sm:$0xff]  ;;  %v334_v42 = vld [vmem:[#allocation11 + $0x18] sm:$0xff]  ;;  %v330_v45 = vld [vmem:[#allocation5 + $0x8] sm:$0xff] }
  0x84   :  { %v333_v40 = vld [vmem:[#allocation11 + $0x10] sm:$0xff]  ;;  %v791_v53 = vld [vmem:[#allocation7 + $0x8] sm:$0xff]  ;;  %p1446_p4 = pnand %p1445_p3, %p1439_p0 }
  0x85   :  { %1225 = vmatpush3.bf16.msra.mxu1 %v1222_v8  ;;  %1217 = vmatpush3.bf16.msra.mxu0 %v1214_v12  ;;  %v1230_v44 = vpack.c.bf16 %v334_v42, %v333_v40  ;;  %v531_v46 = vld [vmem:[#allocation7] sm:$0xff]  ;;  %vm792_vm3 = vcmp.eq.s32.totalorder %v791_v53, 0 }
  0x86   :  { %1227 = vmatprep.subr.bf16.mxu0 %v1226_v41  ;;  %vm532_vm1 = vcmp.eq.s32.totalorder %v531_v46, 0  ;;  %v1066_v53 = vld [vmem:[%s1806_s11] ss:$0 sm:$0xff] }
  0x88   :  { %1154 = vmatmul.mubr.msk.f32.vlgmr.msra.gmra.mrb[0].mxu1 %vm153_vm0, %v236_v14  ;;  %1143 = vmatmul.mubr.msk.f32.vlgmr.msra.gmra.mrb[0].mxu0 %vm153_vm0, %v141_v15 }
  0x89   :  { %1164 = vmatprep.mubr.msk.f32.mxu0 %vm153_vm0, %v329_v43  ;;  %1229 = vmatpush3.bf16.msra.mxu0 %v1226_v41 }
  0x8a   :  { %1231 = vmatprep.subr.bf16.mxu0 %v1230_v44 }
  0x8d   :  { %1233 = vmatpush3.bf16.msra.mxu0 %v1230_v44 }
  0x90   :  { %1165 = vmatmul.mubr.msk.f32.vlgmr.msra.gmra.mrb[2].mxu0 %vm153_vm0, %v330_v45 }
 0x15b   :  { %v1155_v17 = vpop.f32.mrb[0].mxu1  ;;  %v1144_v19 = vpop.f32.mrb[0].mxu0 }
 0x15c   :  { %v320_v20 = vpop.f32.mrb[1].mxu1  ;;  %v226_v22 = vpop.f32.mrb[1].mxu0  ;;  %v326_v26 = vadd.f32 %v1155_v17, %v1063_v16  ;;  %v232_v30 = vadd.f32 %v1144_v19, %v1060_v18 }
 0x15d   :  { %v321_v21 = vadd.f32 %v1063_v16, %v320_v20  ;;  %v227_v25 = vadd.f32 %v1060_v18, %v226_v22 }
 0x15e   :  { %v686_v34 = vmul.f32 %v1695_v23, %v232_v30  ;;  %v687_v35 = vmul.f32 %v1700_v24, %v232_v30  ;;  %v688_v36 = vmul.f32 %v1706_v27, %v232_v30  ;;  %v689_v37 = vmul.f32 %v1717_v32, %v232_v30 }
 0x15f   :  { %1167 = vmatprep.subr.msk.mxu1 %vm153_vm0, %v321_v21  ;;  %v427_v28 = vmul.f32 %v1695_v23, %v227_v25  ;;  %v428_v29 = vmul.f32 %v1700_v24, %v227_v25  ;;  %v429_v31 = vmul.f32 %v1706_v27, %v227_v25  ;;  %v430_v33 = vmul.f32 %v1717_v32, %v227_v25 }
 0x160   :  { %1168 = vmatpush3.xpose.msk.msra.mxu1 %vm153_vm0, %v321_v21 }
 0x161   :  { %1183 = vmatprep.subr.msk.mxu1 %vm153_vm0, %v326_v26  ;;  %1169 = vmatprep.mubr.msk.f32.mxu1 %vm153_vm0, %v427_v28 }
 0x163   :  { %1170 = vmatmul.mubr.msk.f32.vlgmr.msra.gmra.mrb[2].mxu1 %vm153_vm0, %v428_v29 }
 0x164   :  { %1172 = vmatprep.mubr.msk.f32.mxu1 %vm153_vm0, %v429_v31  ;;  %1184 = vmatpush3.xpose.msk.msra.mxu1 %vm153_vm0, %v326_v26 }
 0x167   :  { %1173 = vmatmul.mubr.msk.f32.gmra.mrb[4].mxu1 %vm153_vm0, %v430_v33 }
 0x168   :  { %1185 = vmatprep.mubr.msk.f32.mxu1 %vm153_vm0, %v686_v34 }
 0x16b   :  { %1186 = vmatmul.mubr.msk.f32.vlgmr.msra.gmra.mrb[6].mxu1 %vm153_vm0, %v687_v35 }
 0x16c   :  { %1188 = vmatprep.mubr.msk.f32.mxu1 %vm153_vm0, %v688_v36 }
 0x16f   :  { %1189 = vmatmul.mubr.msk.f32.gmra.mrb[8].mxu1 %vm153_vm0, %v689_v37 }
 0x236   :  { %v1171_v47 = vpop.f32.mrb[2].mxu1 }
 0x237   :  { %v512_v48 = vpop.f32.mrb[3].mxu1  ;;  %v534_v51 = vsel %vm532_vm1, -1e+09, %v1171_v47 }
 0x238   :  { %v533_v49 = vsel %vm532_vm1, -1e+09, %v512_v48  ;;  %v541_v56 = vsel %vm537_vm2, %v534_v51, -inf }
 0x239   :  { %v538_v50 = vsel %vm537_vm2, %v533_v49, -inf }
 0x23a   :  { %539 = vmax.xlane.f32.xlu0 %v538_v50  ;;  %v1174_v52 = vpop.f32.mrb[4].mxu1 }
 0x23b   :  { %v522_v54 = vpop.f32.mrb[5].mxu1  ;;  %v536_v58 = vsel %vm532_vm1, -1e+09, %v1174_v52  ;;  %v1166_v52 = vpop.f32.mrb[2].mxu0 }
 0x23c   :  { %v535_v55 = vsel %vm532_vm1, -1e+09, %v522_v54  ;;  %v547_v63 = vsel %vm537_vm2, %v536_v58, -inf  ;;  %v414_v54 = vpop.f32.mrb[3].mxu0 }
 0x23d   :  { %v544_v57 = vsel %vm537_vm2, %v535_v55, -inf }
 0x23e   :  { %542 = vmax.xlane.f32.xlu0 %v541_v56  ;;  %v1187_v59 = vpop.f32.mrb[6].mxu1  ;;  %545 = vmax.xlane.f32.xlu1 %v544_v57  ;;  %v420_v56 = vadd.f32 %v1166_v52, %v1066_v53 }
 0x23f   :  { %v771_v60 = vpop.f32.mrb[7].mxu1  ;;  %v794_v0 = vsel %vm792_vm3, -1e+09, %v1187_v59 }
 0x240   :  { %v793_v61 = vsel %vm792_vm3, -1e+09, %v771_v60  ;;  %v800_v5 = vsel %vm537_vm2, %v794_v0, -inf }
 0x241   :  { %v797_v62 = vsel %vm537_vm2, %v793_v61, -inf }
 0x242   :  { %798 = vmax.xlane.f32.xlu0 %v797_v62  ;;  %v1190_v1 = vpop.f32.mrb[8].mxu1  ;;  %548 = vmax.xlane.f32.xlu1 %v547_v63 }
 0x243   :  { %v781_v2 = vpop.f32.mrb[9].mxu1  ;;  %v796_v6 = vsel %vm792_vm3, -1e+09, %v1190_v1 }
 0x244   :  { %v795_v3 = vsel %vm792_vm3, -1e+09, %v781_v2  ;;  %v806_v7 = vsel %vm537_vm2, %v796_v6, -inf }
 0x245   :  { %v803_v4 = vsel %vm537_vm2, %v795_v3, -inf }
 0x246   :  { %804 = vmax.xlane.f32.xlu0 %v803_v4  ;;  %801 = vmax.xlane.f32.xlu1 %v800_v5 }
 0x24a   :  { %807 = vmax.xlane.f32.xlu1 %v806_v7 }
 0x2c7   :  { %v540_v8 = vpop.xlane.xlu0 %539 }
 0x2c8   :  { %v550_v9 = vsub.f32 %v533_v49, %v540_v8 }
 0x2ca   :  { %v554_v10 = vmul.f32 1.442695, %v550_v9 }
 0x2cb   :  { %v543_v11 = vpop.xlane.xlu0 %542  ;;  %v546_v12 = vpop.xlane.xlu1 %545 }
 0x2cc   :  { %1252 = vpow2.f32 %v554_v10  ;;  %v551_v13 = vsub.f32 %v534_v51, %v543_v11  ;;  %v552_v14 = vsub.f32 %v535_v55, %v546_v12  ;;  %v415_v55 = vadd.f32 %v1066_v53, %v414_v54 }
 0x2ce   :  { %v556_v15 = vmul.f32 1.442695, %v551_v13  ;;  %v558_v16 = vmul.f32 1.442695, %v552_v14  ;;  %1175 = vmatprep.subr.mxu0 %v415_v55 }
 0x2cf   :  { %v799_v17 = vpop.xlane.xlu0 %798  ;;  %v549_v18 = vpop.xlane.xlu1 %548  ;;  %1176 = vmatpush3.msra.mxu0 %v415_v55 }
 0x2d0   :  { %1254 = vpow2.f32 %v556_v15  ;;  %v809_v19 = vsub.f32 %v793_v61, %v799_v17  ;;  %v553_v20 = vsub.f32 %v536_v58, %v549_v18  ;;  %1191 = vmatprep.subr.mxu0 %v420_v56  ;;  %v945_v17 = vld [vmem:[#allocation13] sm:$0xff]  ;;  %v946_v18 = vld [vmem:[#allocation13 + $0x8] sm:$0xff] }
 0x2d1   :  { %1256 = vpow2.f32 %v558_v16 }
 0x2d2   :  { %v813_v21 = vmul.f32 1.442695, %v809_v19  ;;  %v560_v22 = vmul.f32 1.442695, %v553_v20  ;;  %v1234_v19 = vpack.c.bf16 %v946_v18, %v945_v17  ;;  %v947_v20 = vld [vmem:[#allocation13 + $0x10] sm:$0xff] }
 0x2d3   :  { %v805_v25 = vpop.xlane.xlu0 %804  ;;  %v802_v26 = vpop.xlane.xlu1 %801 }
 0x2d4   :  { %1258 = vpow2.f32 %v813_v21  ;;  %v811_v28 = vsub.f32 %v795_v3, %v805_v25  ;;  %v810_v29 = vsub.f32 %v794_v0, %v802_v26  ;;  %1235 = vmatprep.subr.bf16.mxu1 %v1234_v19  ;;  %v948_v21 = vld [vmem:[#allocation13 + $0x18] sm:$0xff] }
 0x2d5   :  { %1260 = vpow2.f32 %v560_v22  ;;  %1237 = vmatpush3.bf16.msra.mxu1 %v1234_v19  ;;  %v1238_v22 = vpack.c.bf16 %v948_v21, %v947_v20 }
 0x2d6   :  { %v1253_v30 = vpop.eup %1252  ;;  %v817_v31 = vmul.f32 1.442695, %v811_v28  ;;  %v815_v33 = vmul.f32 1.442695, %v810_v29 }
 0x2d7   :  { %v808_v34 = vpop.xlane.xlu1 %807  ;;  %v562_v35 = vsel %vm537_vm2, %v1253_v30, 0.0  ;;  %1239 = vmatprep.subr.bf16.mxu1 %v1238_v22 }
 0x2d8   :  { %1262 = vpow2.f32 %v817_v31  ;;  %v812_v36 = vsub.f32 %v796_v6, %v808_v34  ;;  %563 = vadd.xlane.f32.xlu0 %v562_v35 }
 0x2d9   :  { %1264 = vpow2.f32 %v815_v33  ;;  %1241 = vmatpush3.bf16.msra.mxu1 %v1238_v22 }
 0x2da   :  { %v1255_v37 = vpop.eup %1254  ;;  %v819_v38 = vmul.f32 1.442695, %v812_v36 }
 0x2db   :  { %v1257_v39 = vpop.eup %1256  ;;  %v565_v40 = vsel %vm537_vm2, %v1255_v37, 0.0 }
 0x2dc   :  { %1266 = vpow2.f32 %v819_v38  ;;  %566 = vadd.xlane.f32.xlu1 %v565_v40  ;;  %v568_v41 = vsel %vm537_vm2, %v1257_v39, 0.0 }
 0x2dd   :  { %569 = vadd.xlane.f32.xlu0 %v568_v41 }
 0x2de   :  { %v1259_v42 = vpop.eup %1258 }
 0x2df   :  { %v1261_v43 = vpop.eup %1260  ;;  %v821_v44 = vsel %vm537_vm2, %v1259_v42, 0.0 }
 0x2e0   :  { %v571_v45 = vsel %vm537_vm2, %v1261_v43, 0.0 }
 0x2e1   :  { %822 = vadd.xlane.f32.xlu0 %v821_v44  ;;  %572 = vadd.xlane.f32.xlu1 %v571_v45 }
 0x2e2   :  { %v1263_v46 = vpop.eup %1262 }
 0x2e3   :  { %v1265_v47 = vpop.eup %1264  ;;  %v827_v48 = vsel %vm537_vm2, %v1263_v46, 0.0 }
 0x2e4   :  { %v824_v49 = vsel %vm537_vm2, %v1265_v47, 0.0 }
 0x2e5   :  { %828 = vadd.xlane.f32.xlu0 %v827_v48  ;;  %825 = vadd.xlane.f32.xlu1 %v824_v49 }
 0x2e6   :  { %v1267_v50 = vpop.eup %1266 }
 0x2e7   :  { %v830_v51 = vsel %vm537_vm2, %v1267_v50, 0.0 }
 0x2e9   :  { %831 = vadd.xlane.f32.xlu1 %v830_v51 }
 0x365   :  { %v564_v57 = vpop.xlane.xlu0 %563 }
 0x366   :  { %1268 = vrcp.f32 %v564_v57 }
 0x369   :  { %v567_v58 = vpop.xlane.xlu1 %566 }
 0x36a   :  { %v570_v59 = vpop.xlane.xlu0 %569  ;;  %1270 = vrcp.f32 %v567_v58 }
 0x36b   :  { %1272 = vrcp.f32 %v570_v59 }
 0x36e   :  { %v823_v60 = vpop.xlane.xlu0 %822  ;;  %v573_v61 = vpop.xlane.xlu1 %572 }
 0x36f   :  { %1274 = vrcp.f32 %v823_v60 }
 0x370   :  { %v1269_v62 = vpop.eup %1268  ;;  %1276 = vrcp.f32 %v573_v61 }
 0x371   :  { %v575_v63 = vmul.f32 %v1269_v62, %v1253_v30 }
 0x372   :  { %v829_v0 = vpop.xlane.xlu0 %828  ;;  %v826_v1 = vpop.xlane.xlu1 %825 }
 0x373   :  { %1278 = vrcp.f32 %v829_v0  ;;  %1177 = vmatprep.mubr.msk.f32.mxu0 %vm537_vm2, %v575_v63 }
 0x374   :  { %v1271_v2 = vpop.eup %1270  ;;  %1280 = vrcp.f32 %v826_v1 }
 0x375   :  { %v1273_v3 = vpop.eup %1272  ;;  %v577_v4 = vmul.f32 %v1271_v2, %v1255_v37 }
 0x376   :  { %v832_v5 = vpop.xlane.xlu1 %831  ;;  %v579_v6 = vmul.f32 %v1273_v3, %v1257_v39 }
 0x377   :  { %1282 = vrcp.f32 %v832_v5  ;;  %1178 = vmatmul.mubr.msk.f32.vlgmr.msra.gmra.mrb[4].mxu0 %vm537_vm2, %v577_v4 }
 0x378   :  { %1192 = vmatpush3.msra.mxu0 %v420_v56  ;;  %1180 = vmatprep.mubr.msk.f32.mxu0 %vm537_vm2, %v579_v6 }
 0x379   :  { %v1275_v7 = vpop.eup %1274 }
 0x37a   :  { %v1277_v8 = vpop.eup %1276  ;;  %v834_v9 = vmul.f32 %v1275_v7, %v1259_v42 }
 0x37b   :  { %v581_v10 = vmul.f32 %v1277_v8, %v1261_v43 }
 0x37d   :  { %v1279_v11 = vpop.eup %1278  ;;  %1181 = vmatmul.mubr.msk.f32.gmra.mrb[6].mxu0 %vm537_vm2, %v581_v10 }
 0x37e   :  { %v1281_v12 = vpop.eup %1280  ;;  %1193 = vmatprep.mubr.msk.f32.mxu0 %vm537_vm2, %v834_v9  ;;  %v838_v13 = vmul.f32 %v1279_v11, %v1263_v46 }
 0x37f   :  { %v836_v14 = vmul.f32 %v1281_v12, %v1265_v47 }
 0x381   :  { %v1283_v15 = vpop.eup %1282  ;;  %1194 = vmatmul.mubr.msk.f32.vlgmr.msra.gmra.mrb[8].mxu0 %vm537_vm2, %v836_v14 }
 0x382   :  { %1196 = vmatprep.mubr.msk.f32.mxu0 %vm537_vm2, %v838_v13  ;;  %v840_v16 = vmul.f32 %v1283_v15, %v1267_v50 }
 0x385   :  { %1197 = vmatmul.mubr.msk.f32.gmra.mrb[10].mxu0 %vm537_vm2, %v840_v16 }
 0x44a   :  { %v1179_v25 = vpop.f32.mrb[4].mxu0 }
 0x44b   :  { %v680_v26 = vmul.f32 %v1179_v25, %v1700_v24  ;;  %v660_v28 = vpop.f32.mrb[5].mxu0 }
 0x44c   :  { %v679_v29 = vmul.f32 %v660_v28, %v1695_v23 }
 0x44e   :  { %v683_v30 = vadd.f32 %v680_v26, %v679_v29 }
 0x450   :  { %v1182_v31 = vpop.f32.mrb[6].mxu0 }
 0x451   :  { %v670_v33 = vpop.f32.mrb[7].mxu0  ;;  %v682_v35 = vmul.f32 %v1182_v31, %v1717_v32 }
 0x452   :  { %v681_v34 = vmul.f32 %v670_v33, %v1706_v27 }
 0x454   :  { %v684_v36 = vadd.f32 %v683_v30, %v681_v34  ;;  %v1195_v37 = vpop.f32.mrb[8].mxu0 }
 0x455   :  { %v939_v38 = vmul.f32 %v1195_v37, %v1700_v24  ;;  %v919_v39 = vpop.f32.mrb[9].mxu0  ;;  %v1087_v24 = vld [vmem:[%s1807_s12] ss:$0 sm:$0xff] }
 0x456   :  { %v685_v40 = vadd.f32 %v684_v36, %v682_v35  ;;  %v938_v41 = vmul.f32 %v919_v39, %v1695_v23 }
 0x458   :  { %v942_v42 = vadd.f32 %v939_v38, %v938_v41  ;;  %v1198_v43 = vpop.f32.mrb[10].mxu0  ;;  %1207 = vmatprep.mubr.msk.f32.mxu1 %vm153_vm0, %v685_v40 }
 0x459   :  { %v929_v44 = vpop.f32.mrb[11].mxu0  ;;  %v941_v46 = vmul.f32 %v1198_v43, %v1717_v32 }
 0x45a   :  { %v940_v45 = vmul.f32 %v929_v44, %v1706_v27 }
 0x45c   :  { %v943_v47 = vadd.f32 %v942_v42, %v940_v45 }
 0x45e   :  { %v944_v48 = vadd.f32 %v943_v47, %v941_v46 }
 0x460   :  { %1208 = vmatmul.mubr.msk.f32.vlgmr.msra.gmra.mrb[10].mxu1 %vm153_vm0, %v944_v48 }
 0x533   :  { %v1209_v23 = vpop.f32.mrb[10].mxu1 }
 0x534   :  { %v1034_v49 = vadd.f32 %v1209_v23, %v1087_v24  ;;  %v1028_v50 = vpop.f32.mrb[11].mxu1 }
 0x535   :  { %v1029_v51 = vadd.f32 %v1087_v24, %v1028_v50 }
 0x536   :  { %1039 = vst.msk [vmem:[#allocation14 + $0x8] sm:$0xff] %vm153_vm0, %v1034_v49 }
 0x537   :  { %1037 = vst.msk [vmem:[#allocation14] sm:$0xff] %vm153_vm0, %v1029_v51 }
 0x538   :  { %1449 = shalt.err (!%p1446_p4)
}
 0x539   :  { %s1450_s23 = scalar_lea.hbm %s1808_s13, 256 }
 0x53a   :  { %p1451_p5 = scmp.ne.s32.totalorder %s1808_s13, %s1450_s23  ;;  %p1454_p6 = scmp.lt.u32.totalorder %s1450_s23, %s1808_s13 }
 0x53c   :  { %p1456_p7 = pnand %p1454_p6, %p1451_p5 }
 0x53e   :  { %1459 = shalt.err (!%p1456_p7)
}
 0x53f   :  { %1051 = dma.vmem_to_hbm [thread:$0]  %s1046_s1, 256, %s1808_s13, [#allocation4], %s1472_s20, %s1472_s20, %s1473_s21  }
 0x540   :  { %1468 = dma.done.wait [#allocation4], 256  }
 0x541   :  { %1469 = vsyncadd [#allocation4], 4294967040 }
 0x542   :  { %1055 = vsyncpa [#allocation3], 1 }
 0x543   :  { %1056 = vsyncpa [#allocation6], 1 }
 0x544   :  { %1057 = vsyncpa [#allocation9], 1 }
 0x545   :  { %1058 = vsyncpa [#allocation12], 1 }
 0x546   :  { %1059 = vsyncpa [#allocation4], 1 }

</bundles_post_ra>
